<compile_context>
chip_gen: v6e
topology: v6e:2x2x1
jax: 0.10.0
libtpu: 0.0.40
codegen_flags: <defaults>
</compile_context>

<pallas_src>
import jax
import jax.numpy as jnp
from jax import lax
from jax.experimental import pallas as pl
from jax.experimental.pallas import tpu as pltpu

BN_EPS = 1e-5
_MIB = 1024 * 1024


def _round_up(v, m):
    return (v + m - 1) // m * m


def _pick_tile(dim_p, cap):
    """Largest multiple of 128 that divides dim_p and is <= cap (floor 128)."""
    best = 128
    t = 128
    cap = max(int(cap), 128)
    while t <= min(dim_p, cap):
        if dim_p % t == 0:
            best = t
        t += 128
    return best


def _vmem_capacity_bytes():
    try:
        info = pltpu.get_tpu_info()
        cap = getattr(info, "vmem_capacity_bytes", None)
        if cap:
            return int(cap)
    except Exception:
        pass
    return 64 * _MIB  # conservative (v7x-sized) fallback


# ---------------------------------------------------------------------------
# Kernels
# ---------------------------------------------------------------------------
def _make_fused_kernel(tk, tn, x_resident, acc_in_out):
    """Linear (bias dropped; BN cancels it) -> BatchNorm1d(batch stats) -> ReLU."""

    def body(x_ref, w_ref, g_ref, bt_ref, o_ref, acc_ref):
        j = pl.program_id(0)
        k = pl.program_id(1)

        @pl.when(k == 0)
        def _():
            acc_ref[...] = jnp.zeros_like(acc_ref)

        if x_resident:
            ks = pl.multiple_of(k * tk, tk)
            x_blk = x_ref[:, pl.ds(ks, tk)]          # (B, tk) from resident slab
        else:
            x_blk = x_ref[...]                       # (B, tk) tile

        # (B, tk) @ (tn, tk)^T -> (B, tn): contract dim 1 with dim 1 so the
        # PyTorch (out, in) weight layout feeds the MXU with no host transpose.
        acc_ref[...] += lax.dot_general(
            x_blk, w_ref[...],
            dimension_numbers=(((1,), (1,)), ((), ())),
            preferred_element_type=jnp.float32)

        @pl.when(k == pl.num_programs(1) - 1)
        def _():
            js = pl.multiple_of(j * tn, tn)
            y = acc_ref[...].astype(jnp.float32)                  # (B, tn)
            inv_b = jnp.float32(1.0 / y.shape[0])
            mean = jnp.sum(y, axis=0, keepdims=True) * inv_b       # (1, tn)
            d = y - mean
            var = jnp.sum(d * d, axis=0, keepdims=True) * inv_b    # two-pass
            g = g_ref[:, pl.ds(js, tn)].astype(jnp.float32)
            bt = bt_ref[:, pl.ds(js, tn)].astype(jnp.float32)
            y_bn = d * lax.rsqrt(var + BN_EPS) * g + bt
            o_ref[...] = jnp.maximum(y_bn, 0.0).astype(o_ref.dtype)

    if acc_in_out:
        def kernel(x_ref, w_ref, g_ref, bt_ref, o_ref):
            body(x_ref, w_ref, g_ref, bt_ref, o_ref, o_ref)
    else:
        def kernel(x_ref, w_ref, g_ref, bt_ref, o_ref, acc_ref):
            body(x_ref, w_ref, g_ref, bt_ref, o_ref, acc_ref)
    return kernel


def _make_linear_kernel(tk, tn, x_resident, acc_in_out):
    """activation=False branch: plain Linear, bias added at K-finalize."""

    def body(x_ref, w_ref, b_ref, o_ref, acc_ref):
        j = pl.program_id(0)
        k = pl.program_id(1)

        @pl.when(k == 0)
        def _():
            acc_ref[...] = jnp.zeros_like(acc_ref)

        if x_resident:
            ks = pl.multiple_of(k * tk, tk)
            x_blk = x_ref[:, pl.ds(ks, tk)]
        else:
            x_blk = x_ref[...]

        acc_ref[...] += lax.dot_general(
            x_blk, w_ref[...],
            dimension_numbers=(((1,), (1,)), ((), ())),
            preferred_element_type=jnp.float32)

        @pl.when(k == pl.num_programs(1) - 1)
        def _():
            js = pl.multiple_of(j * tn, tn)
            b = b_ref[:, pl.ds(js, tn)].astype(jnp.float32)
            o_ref[...] = (acc_ref[...].astype(jnp.float32) + b).astype(o_ref.dtype)

    if acc_in_out:
        def kernel(x_ref, w_ref, b_ref, o_ref):
            body(x_ref, w_ref, b_ref, o_ref, o_ref)
    else:
        def kernel(x_ref, w_ref, b_ref, o_ref, acc_ref):
            body(x_ref, w_ref, b_ref, o_ref, acc_ref)
    return kernel


# ---------------------------------------------------------------------------
# Wrapper
# ---------------------------------------------------------------------------
def linear_block(x, weight, bias, gamma=None, beta=None, activation=True,
                 out_dtype=None, deep_weight_buffering=False):
    """Pallas implementation of LinearBlock.forward.

    x:      (B, C_in)
    weight: (C_out, C_in)   PyTorch layout (never transposed on the host)
    bias:   (C_out,)
    gamma, beta: (C_out,)   BatchNorm affine params (used iff activation=True)
    """
    B, C_in = x.shape
    C_out, c_in_w = weight.shape
    assert c_in_w == C_in, "weight shape mismatch"
    if activation and (gamma is None or beta is None):
        raise ValueError("activation=True requires gamma and beta")
    out_dtype = jnp.dtype(out_dtype or x.dtype)

    in_bytes = jnp.dtype(x.dtype).itemsize
    w_bytes = jnp.dtype(weight.dtype).itemsize
    out_bytes = out_dtype.itemsize

    # --- Generation-aware VMEM budget ---------------------------------------
    vmem_cap = _vmem_capacity_bytes()
    big_vmem = vmem_cap >= 96 * _MIB          # v5e / v6e (128 MiB physical)
    multi_core = not big_vmem                 # v7x-like: 64 MiB, 2 TensorCores
    budget = int(vmem_cap * 0.6)
    vmem_limit = min(int(vmem_cap * 0.75), 100 * _MIB)

    # --- Tile selection (pad only to 128 multiples; tiles divide padded dims)
    C_in_p = _round_up(C_in, 128)
    C_out_p = _round_up(C_out, 128)
    tk = _pick_tile(C_in_p, 1024 if big_vmem else 512)
    tn = _pick_tile(C_out_p, 512 if big_vmem else 256)
    if multi_core and C_out_p // tn < 2 and C_out_p >= 256:
        # Give the "parallel" j axis >= 2 tiles so both v7x cores get work.
        tn = _pick_tile(C_out_p, C_out_p // 2)

    acc_in_out = out_dtype == jnp.dtype(jnp.float32)

    def footprint(tk_, tn_, x_res):
        x_b = 2 * B * (C_in_p if x_res else tk_) * in_bytes      # double-buffered
        w_b = (3 if deep_weight_buffering else 2) * tn_ * tk_ * w_bytes
        o_b = 2 * B * tn_ * out_bytes
        a_b = 0 if acc_in_out else B * tn_ * 4
        v_b = 2 * 2 * C_out_p * 4                                # resident vectors
        return x_b + w_b + o_b + a_b + v_b

    # Keep x resident (fetched once instead of nj times) whenever it fits.
    x_resident = 2 * B * C_in_p * in_bytes <= budget // 2
    while footprint(tk, tn, x_resident) > budget:
        if x_resident:
            x_resident = False
        elif tk > 128:
            tk = _pick_tile(C_in_p, tk - 128)
        elif tn > 128:
            tn = _pick_tile(C_out_p, tn - 128)
        else:
            break
    if footprint(tk, tn, x_resident) > int(vmem_cap * 0.9):
        # TODO(synk): B-tiled two-pass-BN path (partial sum/sumsq then an
        # elementwise normalize+ReLU kernel) for very large batches.
        raise ValueError(
            f"linear_block: batch {B} too large for the single-pass fused BN "
            f"kernel on this TPU generation ({vmem_cap // _MIB} MiB VMEM).")

    nj = C_out_p // tn
    nk = C_in_p // tk

    # --- Padding (only when unaligned; K zeros are matmul no-ops, N zeros
    # flow through BN+ReLU as exact zeros). For repeated calls, pre-pad the
    # parameters once and pass them already aligned to skip this entirely.
    x_p = x if C_in_p == C_in else jnp.pad(x, ((0, 0), (0, C_in_p - C_in)))
    w_p = weight
    if weight.shape != (C_out_p, C_in_p):
        w_p = jnp.pad(weight, ((0, C_out_p - C_out), (0, C_in_p - C_in)))

    def _pad_vec(v):
        v = v.reshape(1, -1)
        if v.shape[1] == C_out_p:
            return v
        return jnp.pad(v, ((0, 0), (0, C_out_p - v.shape[1])))

    # --- Specs ----------------------------------------------------------------
    if x_resident:
        x_spec = pl.BlockSpec((B, C_in_p), lambda j, k: (0, 0))   # resident slab
    else:
        x_spec = pl.BlockSpec((B, tk), lambda j, k: (0, k))
    if deep_weight_buffering:
        w_spec = pl.BlockSpec((tn, tk), lambda j, k: (j, k),
                              pipeline_mode=pl.Buffered(3))
    else:
        w_spec = pl.BlockSpec((tn, tk), lambda j, k: (j, k))
    vec_spec = pl.BlockSpec((1, C_out_p), lambda j, k: (0, 0))    # resident
    out_spec = pl.BlockSpec((B, tn), lambda j, k: (0, j))

    scratch = [] if acc_in_out else [pltpu.VMEM((B, tn), jnp.float32)]

    cost = pl.CostEstimate(
        flops=2 * B * C_in_p * C_out_p,
        transcendentals=C_out_p if activation else 0,
        bytes_accessed=int((1 if x_resident else nj) * B * C_in_p * in_bytes
                           + C_out_p * C_in_p * w_bytes
                           + B * C_out_p * out_bytes
                           + 2 * C_out_p * 4),
    )
    cparams = pltpu.CompilerParams(
        dimension_semantics=("parallel", "arbitrary"),
        vmem_limit_bytes=int(vmem_limit),
    )
    grid_args = dict(num_scalar_prefetch=0, grid=(nj, nk),
                     out_specs=out_spec, scratch_shapes=scratch)

    if activation:
        kernel = _make_fused_kernel(tk, tn, x_resident, acc_in_out)
        out_p = pl.pallas_call(
            kernel,
            out_shape=jax.ShapeDtypeStruct((B, C_out_p), out_dtype),
            grid_spec=pltpu.PrefetchScalarGridSpec(
                in_specs=[x_spec, w_spec, vec_spec, vec_spec], **grid_args),
            compiler_params=cparams,
            cost_estimate=cost,
        )(x_p, w_p, _pad_vec(gamma), _pad_vec(beta))
    else:
        kernel = _make_linear_kernel(tk, tn, x_resident, acc_in_out)
        out_p = pl.pallas_call(
            kernel,
            out_shape=jax.ShapeDtypeStruct((B, C_out_p), out_dtype),
            grid_spec=pltpu.PrefetchScalarGridSpec(
                in_specs=[x_spec, w_spec, vec_spec], **grid_args),
            compiler_params=cparams,
            cost_estimate=cost,
        )(x_p, w_p, _pad_vec(bias))

    return out_p if C_out_p == C_out else out_p[:, :C_out]


# ---------------------------------------------------------------------------
# Reference + smoke test
# ---------------------------------------------------------------------------
def _reference(x, weight, bias, gamma, beta, activation=True):
    y = x @ weight.T + bias
    if not activation:
        return y
    mean = jnp.mean(y, axis=0, keepdims=True)
    var = jnp.mean((y - mean) ** 2, axis=0, keepdims=True)
    y = (y - mean) / jnp.sqrt(var + BN_EPS) * gamma + beta
    return jnp.maximum(y, 0.0)


if __name__ == "__main__":
    key = jax.random.PRNGKey(0)

    def torch_like_params(k, c_in, c_out):
        kw, kb = jax.random.split(k)
        bound = 1.0 / jnp.sqrt(jnp.float32(c_in))
        w = jax.random.uniform(kw, (c_out, c_in), jnp.float32, -bound, bound)
        b = jax.random.uniform(kb, (c_out,), jnp.float32, -bound, bound)
        g = jnp.ones((c_out,), jnp.float32)    # BatchNorm1d default affine init
        bt = jnp.zeros((c_out,), jnp.float32)
        return w, b, g, bt

    # Case 1: small single-tile LinearBlock (activation=True).
    B, C_in, C_out = 8, 32, 16
    k0, k1, key = jax.random.split(key, 3)
    x = jax.random.normal(k0, (B, C_in), jnp.float32)
    w, b, g, bt = torch_like_params(k1, C_in, C_out)
    out = jax.block_until_ready(linear_block(x, w, b, g, bt, activation=True))
    ref = _reference(x, w, b, g, bt, activation=True)
    assert out.shape == (B, C_out)
    assert jnp.allclose(out, ref, atol=2e-2, rtol=2e-2), "mismatch (act) vs reference"

    # Case 2: activation=False (plain Linear + bias).
    out2 = jax.block_until_ready(linear_block(x, w, b, activation=False))
    ref2 = _reference(x, w, b, g, bt, activation=False)
    assert jnp.allclose(out2, ref2, atol=1e-2, rtol=1e-2), "mismatch (no-act) vs reference"

    # Case 3: multi-tile (nj > 1, nk > 1), resident x and resident gamma/beta.
    B, C_in, C_out = 16, 1280, 520
    k0, k1, key = jax.random.split(key, 3)
    x = jax.random.normal(k0, (B, C_in), jnp.float32)
    w, b, g, bt = torch_like_params(k1, C_in, C_out)
    out3 = jax.block_until_ready(linear_block(x, w, b, g, bt, activation=True))
    ref3 = _reference(x, w, b, g, bt, activation=True)
    assert out3.shape == (B, C_out)
    assert jnp.allclose(out3, ref3, atol=3e-2, rtol=3e-2), "mismatch (multi-tile) vs reference"

    # Case 4: bf16 output -> exercises the separate f32 accumulator scratch path.
    out4 = jax.block_until_ready(
        linear_block(x, w, b, g, bt, activation=True, out_dtype=jnp.bfloat16))
    assert jnp.allclose(out4.astype(jnp.float32), ref3, atol=1e-1, rtol=1e-1), \
        "mismatch (bf16 out) vs reference"

    print("KERNEL_OK")
</pallas_src>

<mosaic_0001>
module attributes {stable_mosaic.version = 11 : i64} {
  func.func @kernel(%arg0: i32, %arg1: i32, %arg2: memref<8x128xf32, #tpu.memory_space<vmem>>, %arg3: memref<128x128xf32, #tpu.memory_space<vmem>>, %arg4: memref<1x128xf32, #tpu.memory_space<vmem>>, %arg5: memref<1x128xf32, #tpu.memory_space<vmem>>, %arg6: memref<8x128xf32, #tpu.memory_space<vmem>>) attributes {dimension_semantics = [#tpu.dimension_semantics<parallel>, #tpu.dimension_semantics<arbitrary>], iteration_bounds = array<i64: 1, 1>, scalar_prefetch = 0 : i64, scratch_operands = 0 : i64, tpu.core_type = #tpu.core_type<tc>, window_params = [{pipeline_mode = #tpu.pipeline_mode<synchronous>, transform_indices = @transform_0, window_bounds = array<i64: 8, 128>}, {transform_indices = @transform_1, window_bounds = array<i64: 128, 128>}, {pipeline_mode = #tpu.pipeline_mode<synchronous>, transform_indices = @transform_2, window_bounds = array<i64: 1, 128>}, {pipeline_mode = #tpu.pipeline_mode<synchronous>, transform_indices = @transform_3, window_bounds = array<i64: 1, 128>}, {transform_indices = @transform_4, window_bounds = array<i64: 8, 128>}]} {
    %c0_i32 = arith.constant 0 : i32
    %0 = arith.cmpi eq, %arg1, %c0_i32 : i32
    %1 = arith.extui %0 : i1 to i32
    %c0_i32_0 = arith.constant 0 : i32
    %2 = arith.cmpi ne, %1, %c0_i32_0 : i32
    scf.if %2 {
      %cst_9 = arith.constant 0.000000e+00 : f32
      %15 = vector.broadcast %cst_9 : f32 to vector<8x128xf32>
      %c0_10 = arith.constant 0 : index
      %c0_11 = arith.constant 0 : index
      %16 = vector.load %arg6[%c0_10, %c0_11] : memref<8x128xf32, #tpu.memory_space<vmem>>, vector<8x128xf32>
      tpu.vector_store %arg6[%c0_10, %c0_11], %15 {strides = array<i32>} : memref<8x128xf32, #tpu.memory_space<vmem>>, vector<8x128xf32>,
    } else {
    }
    %c128_i32 = arith.constant 128 : i32
    %3 = arith.muli %arg1, %c128_i32 : i32
    %4 = tpu.assume_multiple %3, 128 : i32
    %c0 = arith.constant 0 : index
    %5 = arith.index_cast %4 : i32 to index
    %6 = vector.load %arg2[%c0, %5] : memref<8x128xf32, #tpu.memory_space<vmem>>, vector<8x128xf32>
    %c0_1 = arith.constant 0 : index
    %c0_2 = arith.constant 0 : index
    %7 = vector.load %arg6[%c0_1, %c0_2] : memref<8x128xf32, #tpu.memory_space<vmem>>, vector<8x128xf32>
    %c0_3 = arith.constant 0 : index
    %c0_4 = arith.constant 0 : index
    %8 = vector.load %arg3[%c0_3, %c0_4] : memref<128x128xf32, #tpu.memory_space<vmem>>, vector<128x128xf32>
    %cst = arith.constant dense<0.000000e+00> : vector<8x128xf32>
    %9 = tpu.matmul %6, %8, %cst {dimension_numbers = #tpu.dot_dimension_numbers<[1], [1], [0], [0], [0, 0, 1, 0], [], []>} : vector<8x128xf32>, vector<128x128xf32>, vector<8x128xf32> -> vector<8x128xf32>
    %10 = arith.addf %7, %9 : vector<8x128xf32>
    %c0_5 = arith.constant 0 : index
    %c0_6 = arith.constant 0 : index
    %11 = vector.load %arg6[%c0_5, %c0_6] : memref<8x128xf32, #tpu.memory_space<vmem>>, vector<8x128xf32>
    tpu.vector_store %arg6[%c0_5, %c0_6], %10 {strides = array<i32>} : memref<8x128xf32, #tpu.memory_space<vmem>>, vector<8x128xf32>,
    %c0_i32_7 = arith.constant 0 : i32
    %12 = arith.cmpi eq, %arg1, %c0_i32_7 : i32
    %13 = arith.extui %12 : i1 to i32
    %c0_i32_8 = arith.constant 0 : i32
    %14 = arith.cmpi ne, %13, %c0_i32_8 : i32
    scf.if %14 {
      %c128_i32_9 = arith.constant 128 : i32
      %15 = arith.muli %arg0, %c128_i32_9 : i32
      %16 = tpu.assume_multiple %15, 128 : i32
      %c0_10 = arith.constant 0 : index
      %c0_11 = arith.constant 0 : index
      %17 = vector.load %arg6[%c0_10, %c0_11] : memref<8x128xf32, #tpu.memory_space<vmem>>, vector<8x128xf32>
      %cst_12 = arith.constant dense<0.000000e+00> : vector<128xf32>
      %18 = vector.multi_reduction <add>, %17, %cst_12 [0] : vector<8x128xf32> to vector<128xf32>
      %19 = vector.shape_cast %18 : vector<128xf32> to vector<1x128xf32>
      %cst_13 = arith.constant 1.250000e-01 : f32
      %20 = vector.broadcast %cst_13 : f32 to vector<1x128xf32>
      %21 = arith.mulf %19, %20 : vector<1x128xf32>
      %22 = vector.broadcast %21 : vector<1x128xf32> to vector<8x128xf32>
      %23 = arith.subf %17, %22 : vector<8x128xf32>
      %24 = arith.mulf %23, %23 : vector<8x128xf32>
      %cst_14 = arith.constant dense<0.000000e+00> : vector<128xf32>
      %25 = vector.multi_reduction <add>, %24, %cst_14 [0] : vector<8x128xf32> to vector<128xf32>
      %26 = vector.shape_cast %25 : vector<128xf32> to vector<1x128xf32>
      %cst_15 = arith.constant 1.250000e-01 : f32
      %27 = vector.broadcast %cst_15 : f32 to vector<1x128xf32>
      %28 = arith.mulf %26, %27 : vector<1x128xf32>
      %c0_16 = arith.constant 0 : index
      %29 = arith.index_cast %16 : i32 to index
      %30 = vector.load %arg4[%c0_16, %29] : memref<1x128xf32, #tpu.memory_space<vmem>>, vector<1x128xf32>
      %c0_17 = arith.constant 0 : index
      %31 = arith.index_cast %16 : i32 to index
      %32 = vector.load %arg5[%c0_17, %31] : memref<1x128xf32, #tpu.memory_space<vmem>>, vector<1x128xf32>
      %cst_18 = arith.constant 9.99999974E-6 : f32
      %33 = vector.broadcast %cst_18 : f32 to vector<1x128xf32>
      %34 = arith.addf %28, %33 : vector<1x128xf32>
      %35 = math.rsqrt %34 : vector<1x128xf32>
      %36 = vector.broadcast %35 : vector<1x128xf32> to vector<8x128xf32>
      %37 = arith.mulf %23, %36 : vector<8x128xf32>
      %38 = vector.broadcast %30 : vector<1x128xf32> to vector<8x128xf32>
      %39 = arith.mulf %37, %38 : vector<8x128xf32>
      %40 = vector.broadcast %32 : vector<1x128xf32> to vector<8x128xf32>
      %41 = arith.addf %39, %40 : vector<8x128xf32>
      %cst_19 = arith.constant 0.000000e+00 : f32
      %42 = vector.broadcast %cst_19 : f32 to vector<8x128xf32>
      %43 = arith.maximumf %41, %42 : vector<8x128xf32>
      %c0_20 = arith.constant 0 : index
      %c0_21 = arith.constant 0 : index
      %44 = vector.load %arg6[%c0_20, %c0_21] : memref<8x128xf32, #tpu.memory_space<vmem>>, vector<8x128xf32>
      tpu.vector_store %arg6[%c0_20, %c0_21], %43 {strides = array<i32>} : memref<8x128xf32, #tpu.memory_space<vmem>>, vector<8x128xf32>,
    } else {
    }
    return
  }
  func.func @transform_0(%arg0: i32, %arg1: i32) -> (i32, i32) {
    %c0_i32 = arith.constant 0 : i32
    %c0_i32_0 = arith.constant 0 : i32
    %c0_i32_1 = arith.constant 0 : i32
    return %c0_i32, %c0_i32_0 : i32, i32
  }
  func.func @transform_1(%arg0: i32, %arg1: i32) -> (i32, i32) {
    %c0_i32 = arith.constant 0 : i32
    return %arg0, %arg1 : i32, i32
  }
  func.func @transform_2(%arg0: i32, %arg1: i32) -> (i32, i32) {
    %c0_i32 = arith.constant 0 : i32
    %c0_i32_0 = arith.constant 0 : i32
    %c0_i32_1 = arith.constant 0 : i32
    return %c0_i32, %c0_i32_0 : i32, i32
  }
  func.func @transform_3(%arg0: i32, %arg1: i32) -> (i32, i32) {
    %c0_i32 = arith.constant 0 : i32
    %c0_i32_0 = arith.constant 0 : i32
    %c0_i32_1 = arith.constant 0 : i32
    return %c0_i32, %c0_i32_0 : i32, i32
  }
  func.func @transform_4(%arg0: i32, %arg1: i32) -> (i32, i32) {
    %c0_i32 = arith.constant 0 : i32
    %c0_i32_0 = arith.constant 0 : i32
    return %c0_i32, %arg0 : i32, i32
  }
}

</mosaic_0001>

<bundles_post_ra>
// kernel: tpu_custom_call.1
= control target key start
LH: loop header
LB: loop body
LE: loop exit
PB: predicated region body
PF: predicated region fallthrough
CT: control target
= control target key end

     0   :  { %9 = vsyncpa [#allocation3], 0  ;;  %s384_s0 = inlined_call_operand.hbm [shape: f32[8,128], index: 0, kind: input, shape index: {}]   ;;  %s385_s1 = inlined_call_operand.hbm [shape: f32[128,128], index: 1, kind: input, shape index: {}]   ;;  %s386_s2 = inlined_call_operand.vmem [shape: f32[1,128], index: 2, kind: input, shape index: {}]   ;;  %s387_s3 = inlined_call_operand.vmem [shape: f32[1,128], index: 3, kind: input, shape index: {}]   ;;  %s388_s4 = inlined_call_operand.hbm [shape: f32[8,128], index: 4, kind: output, shape index: {}]  }
   0x1   :  { %10 = vsyncpa [#allocation6], 0 }
   0x2   :  { %11 = vsyncpa [#allocation4], 0  ;;  %s337_s15 = smov [#allocation2]   ;;  %s338_s17 = smov [#allocation5]  }
   0x3   :  { %s18_s16 = sshll.u32 %s337_s15, 4  ;;  %s27_s18 = sshll.u32 %s338_s17, 4  ;;  %s19_s16 = int_to_ptr.vmem [resolvable:$true] %s18_s16  ;;  %s28_s18 = int_to_ptr.vmem [resolvable:$true] %s27_s18 }
   0x4   :  { %s279_s19 = scalar_lea.vmem %s19_s16, 128  ;;  %p284_p1 = scmp.lt.s32.totalorder %s19_s16, %s19_s16 }
   0x5   :  { %p280_p0 = scmp.ne.s32.totalorder %s19_s16, %s279_s19  ;;  %p285_p2 = scmp.lt.s32.totalorder %s279_s19, %s279_s19 }
   0x7   :  { %p286_p3 = por %p285_p2, %p284_p1 }
   0x9   :  { %p287_p4 = pnand %p286_p3, %p280_p0 }
   0xb   :  { %290 = shalt.err (!%p287_p4)
}
   0xc   :  { %21 = dma.hbm_to_vmem [thread:$0]  %s384_s0, 128, %s19_s16, [#allocation3]  }
   0xd   :  { %s299_s22 = scalar_lea.vmem %s28_s18, 2048  ;;  %p304_p6 = scmp.lt.s32.totalorder %s28_s18, %s28_s18 }
   0xe   :  { %p300_p5 = scmp.ne.s32.totalorder %s28_s18, %s299_s22  ;;  %p305_p7 = scmp.lt.s32.totalorder %s299_s22, %s299_s22 }
  0x10   :  { %p306_p8 = por %p305_p7, %p304_p6 }
  0x12   :  { %p307_p9 = pnand %p306_p8, %p300_p5 }
  0x14   :  { %310 = shalt.err (!%p307_p9)
}
  0x15   :  { %s339_s23 = smov 128   ;;  %s340_s24 = smov 8  }
  0x16   :  { %33 = dma.hbm_to_vmem [thread:$0]  %s385_s1, 2048, %s28_s18, [#allocation6], %s339_s23, %s339_s23, %s340_s24  }
  0x17   :  { %331 = dma.done.wait [#allocation3], 128  }
  0x18   :  { %332 = vsyncadd [#allocation3], 4294967168 }
  0x19   :  { %333 = dma.done.wait [#allocation6], 2048  }
  0x1a   :  { %334 = vsyncadd [#allocation6], 4294965248  ;;  %v341_v0 = vmov 0.0   ;;  %vm342_vm0 = vmmov 0   ;;  %v70_v1 = vld [vmem:[#allocation5 + $0x78] sm:$0xff]  ;;  %v69_v2 = vld [vmem:[#allocation5 + $0x70] sm:$0xff] }
  0x1b   :  { %227 = vmatprep.subr.mxu0 %v341_v0  ;;  %259 = vmatprep.mubr.msk.f32.mxu0 %vm342_vm0, %v341_v0  ;;  %v68_v3 = vld [vmem:[#allocation5 + $0x68] sm:$0xff]  ;;  %v67_v4 = vld [vmem:[#allocation5 + $0x60] sm:$0xff]  ;;  %v66_v5 = vld [vmem:[#allocation5 + $0x58] sm:$0xff]  ;;  %s343_s29 = smov [#allocation7]  }
  0x1c   :  { %228 = vmatpush3.xpose.msra.mxu0 %v70_v1  ;;  %v65_v6 = vld [vmem:[#allocation5 + $0x50] sm:$0xff]  ;;  %v64_v7 = vld [vmem:[#allocation5 + $0x48] sm:$0xff]  ;;  %v63_v8 = vld [vmem:[#allocation5 + $0x40] sm:$0xff]  ;;  %s195_s30 = sshll.u32 %s343_s29, 4  ;;  %s196_s30 = int_to_ptr.vmem [resolvable:$true] %s195_s30 }
  0x1d   :  { %229 = vmatprep.subr.mxu0 %v341_v0  ;;  %v62_v9 = vld [vmem:[#allocation5 + $0x38] sm:$0xff]  ;;  %v61_v10 = vld [vmem:[#allocation5 + $0x30] sm:$0xff]  ;;  %v60_v11 = vld [vmem:[#allocation5 + $0x28] sm:$0xff]  ;;  %s311_s5 = scalar_lea.vmem %s196_s30, 128  ;;  %p316_p11 = scmp.lt.s32.totalorder %s196_s30, %s196_s30 }
  0x1e   :  { %v59_v12 = vld [vmem:[#allocation5 + $0x20] sm:$0xff]  ;;  %v58_v13 = vld [vmem:[#allocation5 + $0x18] sm:$0xff]  ;;  %v57_v14 = vld [vmem:[#allocation5 + $0x10] sm:$0xff]  ;;  %p312_p10 = scmp.ne.s32.totalorder %s196_s30, %s311_s5  ;;  %p317_p12 = scmp.lt.s32.totalorder %s311_s5, %s311_s5 }
  0x1f   :  { %v56_v15 = vld [vmem:[#allocation5 + $0x8] sm:$0xff]  ;;  %v55_v16 = vld [vmem:[#allocation5] sm:$0xff]  ;;  %v53_v17 = vld [vmem:[#allocation2] sm:$0xff] }
  0x20   :  { %230 = vmatpush3.xpose.msra.mxu0 %v69_v2  ;;  %v208_v38 = vld [vmem:[%s386_s2] ss:$0 sm:$0xff]  ;;  %p318_p13 = por %p317_p12, %p316_p11 }
  0x21   :  { %231 = vmatprep.subr.mxu0 %v341_v0  ;;  %v209_v40 = vld [vmem:[%s387_s3] ss:$0 sm:$0xff] }
  0x22   :  { %p319_p0 = pnand %p318_p13, %p312_p10 }
  0x24   :  { %232 = vmatpush3.xpose.msra.mxu0 %v68_v3 }
  0x25   :  { %233 = vmatprep.subr.mxu0 %v341_v0 }
  0x28   :  { %234 = vmatpush3.xpose.msra.mxu0 %v67_v4 }
  0x29   :  { %235 = vmatprep.subr.mxu0 %v341_v0 }
  0x2c   :  { %236 = vmatpush3.xpose.msra.mxu0 %v66_v5 }
  0x2d   :  { %237 = vmatprep.subr.mxu0 %v341_v0 }
  0x30   :  { %238 = vmatpush3.xpose.msra.mxu0 %v65_v6 }
  0x31   :  { %239 = vmatprep.subr.mxu0 %v341_v0 }
  0x34   :  { %240 = vmatpush3.xpose.msra.mxu0 %v64_v7 }
  0x35   :  { %241 = vmatprep.subr.mxu0 %v341_v0 }
  0x38   :  { %242 = vmatpush3.xpose.msra.mxu0 %v63_v8 }
  0x39   :  { %243 = vmatprep.subr.mxu0 %v341_v0 }
  0x3c   :  { %244 = vmatpush3.xpose.msra.mxu0 %v62_v9 }
  0x3d   :  { %245 = vmatprep.subr.mxu0 %v341_v0 }
  0x40   :  { %246 = vmatpush3.xpose.msra.mxu0 %v61_v10 }
  0x41   :  { %247 = vmatprep.subr.mxu0 %v341_v0 }
  0x44   :  { %248 = vmatpush3.xpose.msra.mxu0 %v60_v11 }
  0x45   :  { %249 = vmatprep.subr.mxu0 %v341_v0 }
  0x48   :  { %250 = vmatpush3.xpose.msra.mxu0 %v59_v12 }
  0x49   :  { %251 = vmatprep.subr.mxu0 %v341_v0 }
  0x4c   :  { %252 = vmatpush3.xpose.msra.mxu0 %v58_v13 }
  0x4d   :  { %253 = vmatprep.subr.mxu0 %v341_v0 }
  0x50   :  { %254 = vmatpush3.xpose.msra.mxu0 %v57_v14 }
  0x51   :  { %255 = vmatprep.subr.mxu0 %v341_v0 }
  0x54   :  { %256 = vmatpush3.xpose.msra.mxu0 %v56_v15 }
  0x55   :  { %257 = vmatprep.subr.mxu0 %v341_v0 }
  0x58   :  { %258 = vmatpush3.xpose.msra.mxu0 %v55_v16 }
  0x5b   :  { %260 = vmatmul.mubr.f32.vlgmr.msra.gmra.mxu0 %v53_v17 }
 0x11b   :  { %v137_v18 = vpop.f32.mrf.mxu0 }
 0x11c   :  { %v148_v20 = vrot.slane %v137_v18, 4 }
 0x11d   :  { %v261_v19 = vpop.f32.mrf.mxu0 }
 0x11e   :  { %v149_v21 = vadd.f32 %v148_v20, %v137_v18 }
 0x120   :  { %v150_v22 = vrot.slane %v149_v21, 2 }
 0x122   :  { %v151_v23 = vadd.f32 %v150_v22, %v149_v21 }
 0x124   :  { %v152_v24 = vrot.slane %v151_v23, 1 }
 0x126   :  { %v153_v25 = vadd.f32 %v152_v24, %v151_v23 }
 0x128   :  { %v154_v26 = vmul.f32 0.125, %v153_v25 }
 0x12a   :  { %v155_v27 = vsub.f32 %v137_v18, %v154_v26 }
 0x12c   :  { %v156_v28 = vmul.f32 %v155_v27, %v155_v27 }
 0x12e   :  { %v157_v29 = vrot.slane %v156_v28, 4 }
 0x130   :  { %v158_v30 = vadd.f32 %v157_v29, %v156_v28 }
 0x132   :  { %v159_v31 = vrot.slane %v158_v30, 2 }
 0x134   :  { %v160_v32 = vadd.f32 %v159_v31, %v158_v30 }
 0x136   :  { %v161_v33 = vrot.slane %v160_v32, 1 }
 0x138   :  { %v162_v34 = vadd.f32 %v161_v33, %v160_v32 }
 0x13a   :  { %v163_v35 = vmul.f32 0.125, %v162_v34 }
 0x13c   :  { %v170_v36 = vadd.f32 1e-05, %v163_v35 }
 0x13e   :  { %269 = vrsqrt.f32 %v170_v36 }
 0x14b   :  { %v270_v37 = vpop.eup %269 }
 0x14c   :  { %v172_v39 = vmul.f32 %v270_v37, %v155_v27 }
 0x14e   :  { %v179_v41 = vmul.f32 %v208_v38, %v172_v39 }
 0x150   :  { %v186_v42 = vadd.f32 %v209_v40, %v179_v41 }
 0x152   :  { %v187_v43 = vmax.f32 %v186_v42, 0.0 }
 0x154   :  { %188 = vst [vmem:[#allocation7] sm:$0xff] %v187_v43 }
 0x155   :  { %322 = shalt.err (!%p319_p0)
}
 0x156   :  { %198 = dma.vmem_to_hbm [thread:$0]  %s196_s30, 128, %s388_s4, [#allocation4]  }
 0x157   :  { %335 = dma.done.wait [#allocation4], 128  }
 0x158   :  { %336 = vsyncadd [#allocation4], 4294967168 }
 0x159   :  { %202 = vsyncpa [#allocation3], 1 }
 0x15a   :  { %203 = vsyncpa [#allocation6], 1 }
 0x15b   :  { %204 = vsyncpa [#allocation4], 1 }

</bundles_post_ra>
